<compile_context>
chip_gen: v7x
topology: tpu7x:2x2x1
jax: 0.10.0
libtpu: 0.0.40
codegen_flags: <defaults>
</compile_context>

<pallas_src>
import functools
import math

import numpy as np

import jax
import jax.numpy as jnp
from jax import lax
from jax.experimental import pallas as pl
from jax.experimental.pallas import tpu as pltpu


# ----------------------------------------------------------------------------
# Host-side constants (cached per (N, D); built only from static python ints).
# ----------------------------------------------------------------------------
def _dft_cos_sin_np(m: int):
    """cos/sin parts of the m-point DFT matrix with exact integer angle reduction."""
    k = np.arange(m, dtype=np.int64)
    kn = (k[:, None] * k[None, :]) % m              # keep angles in [0, 2*pi)
    ang = (2.0 * np.pi / m) * kn.astype(np.float64)
    return np.cos(ang).astype(np.float32), np.sin(ang).astype(np.float32)


def _pick_tiles(n: int):
    """(n_pad, tm): pad the seq dim so row tiles are MXU / sublane friendly."""
    if n <= 128:
        n_pad = -(-n // 8) * 8
        return n_pad, n_pad
    n_pad = -(-n // 128) * 128
    return n_pad, 128


@functools.lru_cache(maxsize=8)
def _fnet_constants(n: int, n_pad: int, d: int):
    """bf16 DFT constants (device arrays), cached per (N, D)."""
    cn, sn = _dft_cos_sin_np(n)
    if n_pad != n:
        pad = ((0, n_pad - n), (0, n_pad - n))
        cn = np.pad(cn, pad)                        # padded rows/cols contribute 0
        sn = np.pad(sn, pad)
    cd, sd = _dft_cos_sin_np(d)
    return (jnp.asarray(cn, dtype=jnp.bfloat16),
            jnp.asarray(sn, dtype=jnp.bfloat16),
            jnp.asarray(cd, dtype=jnp.bfloat16),
            jnp.asarray(-sd, dtype=jnp.bfloat16))   # subtraction folded into sign


def _vmem_cap_bytes() -> int:
    """<= 75% of physical VMEM (headroom for compiler-internal scratch on v7x)."""
    phys = None
    try:
        phys = getattr(pltpu.get_tpu_info(), "vmem_capacity_bytes", None)
    except Exception:
        phys = None
    if not phys:
        phys = 64 << 20                             # conservative (v7x-sized) default
    return int(phys * 3 // 4)


# ----------------------------------------------------------------------------
# Kernel body
# ----------------------------------------------------------------------------
def _fnet_kernel(eps, z_dtype, xbf_ref, xres_ref, cn_ref, sn_ref, cd_ref,
                 nsd_ref, gamma_ref, beta_ref, out_ref):
    x_bf = xbf_ref[...]                                                  # (Np, D) bf16

    # Stage 1: seq-dim DFT for this row tile (bf16 MXU; f32 internal accumulation).
    zc = jnp.dot(cn_ref[...], x_bf,
                 preferred_element_type=z_dtype).astype(jnp.bfloat16)    # (tm, D)
    zs = jnp.dot(sn_ref[...], x_bf,
                 preferred_element_type=z_dtype).astype(jnp.bfloat16)    # (tm, D)

    # Stage 2: hidden-dim DFT, f32 accumulation; -S_D pre-negated host-side.
    fft_real = (jnp.dot(zc, cd_ref[...], preferred_element_type=jnp.float32)
                + jnp.dot(zs, nsd_ref[...], preferred_element_type=jnp.float32))

    # Residual + LayerNorm, strictly f32.
    y = xres_ref[...] + fft_real                                         # (tm, D)
    mean = jnp.mean(y, axis=-1, keepdims=True)
    centered = y - mean
    var = jnp.mean(centered * centered, axis=-1, keepdims=True)          # biased (torch)
    normed = centered * lax.rsqrt(var + eps)
    out_ref[...] = normed * gamma_ref[...] + beta_ref[...]


# ----------------------------------------------------------------------------
# Wrapper
# ----------------------------------------------------------------------------
def fnet_fourier_transform(hidden_states, gamma, beta, *, layer_norm_eps=1e-12):
    """hidden_states: (B, N, D); gamma/beta: (D,) LayerNorm params. Returns f32 (B, N, D)."""
    B, N, D = hidden_states.shape
    n_pad, tm = _pick_tiles(N)
    nt = n_pad // tm

    x = hidden_states.astype(jnp.float32)
    if n_pad != N:
        x = jnp.pad(x, ((0, 0), (0, n_pad - N), (0, 0)))
    x_bf = x.astype(jnp.bfloat16)                    # cast once, outside the kernel

    cn_b, sn_b, cd_b, nsd_b = _fnet_constants(N, n_pad, D)
    gamma2 = jnp.asarray(gamma, jnp.float32).reshape(1, D)
    beta2 = jnp.asarray(beta, jnp.float32).reshape(1, D)

    # VMEM budget: pipelined blocks + in-kernel temps, then clamp below physical.
    live = (2 * n_pad * D * 2                        # x_bf slab (double-buffered)
            + 2 * tm * D * 4                         # f32 residual tile
            + 2 * 2 * tm * n_pad * 2                 # C_N / S_N row tiles
            + 2 * D * D * 2                          # C_D, -S_D (single-buffered)
            + 2 * 2 * D * 4                          # gamma, beta
            + 2 * tm * D * 4                         # out tile
            + 8 * tm * D * 4 + 2 * tm * D * 2)       # in-kernel f32/bf16 temps
    vmem_cap = _vmem_cap_bytes()
    vmem_bytes = max(min(int(live * 1.5) + (2 << 20), vmem_cap), 8 << 20)

    flops = int(B * (4 * n_pad * n_pad * D + 4 * n_pad * D * D + 10 * n_pad * D))
    bytes_accessed = int(B * n_pad * D * (2 + 4 + 4)
                         + 2 * n_pad * n_pad * 2 + 2 * D * D * 2 + 2 * D * 4)

    # v7x megacore: shard the batch axis (keeps the once-per-batch x-slab DMA);
    # only parallelize the row-tile axis when there is a single batch element.
    dim_sem = ("parallel", "arbitrary") if B > 1 else ("parallel", "parallel")

    def _run(use_buffered: bool, z_dtype):
        const_kw = dict(pipeline_mode=pl.Buffered(1)) if use_buffered else {}
        kernel = functools.partial(_fnet_kernel, layer_norm_eps, z_dtype)
        grid_spec = pltpu.PrefetchScalarGridSpec(
            num_scalar_prefetch=0,
            grid=(B, nt),
            in_specs=[
                # bf16 x slab: same block across j -> one DMA per batch element.
                pl.BlockSpec((pl.Squeezed(), n_pad, D), lambda b, j: (b, 0, 0)),
                # f32 residual: only the (tm, D) tile needed this step.
                pl.BlockSpec((pl.Squeezed(), tm, D), lambda b, j: (b, j, 0)),
                # Seq-dim DFT row tiles (streamed per j).
                # TODO(synk): bump to pl.Buffered(3) on v6e if profiling shows the
                # C_N/S_N tile DMA exposed at very large N.
                pl.BlockSpec((tm, n_pad), lambda b, j: (j, 0)),
                pl.BlockSpec((tm, n_pad), lambda b, j: (j, 0)),
                # Hidden-dim DFT constants + LN params: constant index_map.
                pl.BlockSpec((D, D), lambda b, j: (0, 0), **const_kw),
                pl.BlockSpec((D, D), lambda b, j: (0, 0), **const_kw),
                pl.BlockSpec((1, D), lambda b, j: (0, 0), **const_kw),
                pl.BlockSpec((1, D), lambda b, j: (0, 0), **const_kw),
            ],
            out_specs=pl.BlockSpec((pl.Squeezed(), tm, D), lambda b, j: (b, j, 0)),
        )
        return pl.pallas_call(
            kernel,
            out_shape=jax.ShapeDtypeStruct((B, n_pad, D), jnp.float32),
            grid_spec=grid_spec,
            compiler_params=pltpu.CompilerParams(
                dimension_semantics=dim_sem, vmem_limit_bytes=vmem_bytes),
            cost_estimate=pl.CostEstimate(
                flops=flops, transcendentals=B * n_pad,
                bytes_accessed=bytes_accessed),
        )(x_bf, x, cn_b, sn_b, cd_b, nsd_b, gamma2, beta2)

    # Ordered graceful degradation: identical math in every configuration.
    configs = ((True, jnp.bfloat16), (False, jnp.bfloat16), (False, jnp.float32))
    err = None
    out = None
    for use_buffered, z_dtype in configs:
        try:
            out = _run(use_buffered, z_dtype)
            break
        except Exception as e:      # e.g. older JAX rejecting pipeline_mode/bf16 dot out
            err = e
    if out is None:
        raise err

    if n_pad != N:
        out = out[:, :N, :]
    return out


# ----------------------------------------------------------------------------
# Pure-JAX reference matching the PyTorch module.
# ----------------------------------------------------------------------------
def _reference(hidden_states, gamma, beta, eps=1e-12):
    fft_real = jnp.fft.fftn(hidden_states, axes=(1, 2)).real
    y = hidden_states + fft_real
    mean = jnp.mean(y, axis=-1, keepdims=True)
    var = jnp.mean((y - mean) ** 2, axis=-1, keepdims=True)
    return (y - mean) / jnp.sqrt(var + eps) * gamma + beta


if __name__ == "__main__":
    key = jax.random.PRNGKey(0)
    B, N, D = 2, 8, 32  # batch, seq_len, d_model (demo shapes)
    x = jax.random.normal(key, (B, N, D), dtype=jnp.float32)

    # LayerNorm params (PyTorch default init: weight=1, bias=0) — deterministic.
    gamma = jnp.ones((D,), dtype=jnp.float32)
    beta = jnp.zeros((D,), dtype=jnp.float32)

    out = fnet_fourier_transform(x, gamma, beta, layer_norm_eps=1e-12)
    out = jax.block_until_ready(out)

    ref = _reference(x, gamma, beta)
    assert out.shape == (B, N, D)
    # bf16 MXU operands (f32 accumulation) introduce ~1e-2-level error vs the exact
    # f32 FFT reference after LayerNorm; tolerance chosen accordingly.
    assert jnp.allclose(out, ref, atol=5e-2, rtol=5e-2), "mismatch vs reference"
    print("KERNEL_OK")
</pallas_src>

<mosaic_0001>
module attributes {stable_mosaic.version = 11 : i64} {
  func.func @_fnet_kernel(%arg0: i32, %arg1: i32, %arg2: memref<1x8x32xbf16, #tpu.memory_space<vmem>>, %arg3: memref<1x8x32xf32, #tpu.memory_space<vmem>>, %arg4: memref<8x8xbf16, #tpu.memory_space<vmem>>, %arg5: memref<8x8xbf16, #tpu.memory_space<vmem>>, %arg6: memref<32x32xbf16, #tpu.memory_space<vmem>>, %arg7: memref<32x32xbf16, #tpu.memory_space<vmem>>, %arg8: memref<1x32xf32, #tpu.memory_space<vmem>>, %arg9: memref<1x32xf32, #tpu.memory_space<vmem>>, %arg10: memref<1x8x32xf32, #tpu.memory_space<vmem>>) attributes {dimension_semantics = [#tpu.dimension_semantics<parallel>, #tpu.dimension_semantics<arbitrary>], iteration_bounds = array<i64: 2, 1>, scalar_prefetch = 0 : i64, scratch_operands = 0 : i64, tpu.core_type = #tpu.core_type<tc>, window_params = [{transform_indices = @transform_0, window_bounds = array<i64: 1, 8, 32>}, {transform_indices = @transform_1, window_bounds = array<i64: 1, 8, 32>}, {transform_indices = @transform_2, window_bounds = array<i64: 8, 8>}, {transform_indices = @transform_3, window_bounds = array<i64: 8, 8>}, {pipeline_mode = #tpu.pipeline_mode<synchronous>, transform_indices = @transform_4, window_bounds = array<i64: 32, 32>}, {pipeline_mode = #tpu.pipeline_mode<synchronous>, transform_indices = @transform_5, window_bounds = array<i64: 32, 32>}, {pipeline_mode = #tpu.pipeline_mode<synchronous>, transform_indices = @transform_6, window_bounds = array<i64: 1, 32>}, {pipeline_mode = #tpu.pipeline_mode<synchronous>, transform_indices = @transform_7, window_bounds = array<i64: 1, 32>}, {transform_indices = @transform_8, window_bounds = array<i64: 1, 8, 32>}]} {
    %c0 = arith.constant 0 : index
    %c0_0 = arith.constant 0 : index
    %c0_1 = arith.constant 0 : index
    %0 = vector.load %arg2[%c0, %c0_0, %c0_1] : memref<1x8x32xbf16, #tpu.memory_space<vmem>>, vector<1x8x32xbf16>
    %1 = vector.shape_cast %0 : vector<1x8x32xbf16> to vector<8x32xbf16>
    %c0_2 = arith.constant 0 : index
    %c0_3 = arith.constant 0 : index
    %2 = vector.load %arg4[%c0_2, %c0_3] : memref<8x8xbf16, #tpu.memory_space<vmem>>, vector<8x8xbf16>
    %cst = arith.constant dense<0.000000e+00> : vector<8x32xf32>
    %3 = tpu.matmul %2, %1, %cst {dimension_numbers = #tpu.dot_dimension_numbers<[1], [0], [0], [1], [0, 0, 1, 1], [], []>} : vector<8x8xbf16>, vector<8x32xbf16>, vector<8x32xf32> -> vector<8x32xf32>
    %4 = arith.truncf %3 : vector<8x32xf32> to vector<8x32xbf16>
    %c0_4 = arith.constant 0 : index
    %c0_5 = arith.constant 0 : index
    %5 = vector.load %arg5[%c0_4, %c0_5] : memref<8x8xbf16, #tpu.memory_space<vmem>>, vector<8x8xbf16>
    %cst_6 = arith.constant dense<0.000000e+00> : vector<8x32xf32>
    %6 = tpu.matmul %5, %1, %cst_6 {dimension_numbers = #tpu.dot_dimension_numbers<[1], [0], [0], [1], [0, 0, 1, 1], [], []>} : vector<8x8xbf16>, vector<8x32xbf16>, vector<8x32xf32> -> vector<8x32xf32>
    %7 = arith.truncf %6 : vector<8x32xf32> to vector<8x32xbf16>
    %c0_7 = arith.constant 0 : index
    %c0_8 = arith.constant 0 : index
    %8 = vector.load %arg6[%c0_7, %c0_8] : memref<32x32xbf16, #tpu.memory_space<vmem>>, vector<32x32xbf16>
    %cst_9 = arith.constant dense<0.000000e+00> : vector<8x32xf32>
    %9 = tpu.matmul %4, %8, %cst_9 {dimension_numbers = #tpu.dot_dimension_numbers<[1], [0], [0], [1], [0, 0, 1, 1], [], []>} : vector<8x32xbf16>, vector<32x32xbf16>, vector<8x32xf32> -> vector<8x32xf32>
    %c0_10 = arith.constant 0 : index
    %c0_11 = arith.constant 0 : index
    %10 = vector.load %arg7[%c0_10, %c0_11] : memref<32x32xbf16, #tpu.memory_space<vmem>>, vector<32x32xbf16>
    %cst_12 = arith.constant dense<0.000000e+00> : vector<8x32xf32>
    %11 = tpu.matmul %7, %10, %cst_12 {dimension_numbers = #tpu.dot_dimension_numbers<[1], [0], [0], [1], [0, 0, 1, 1], [], []>} : vector<8x32xbf16>, vector<32x32xbf16>, vector<8x32xf32> -> vector<8x32xf32>
    %12 = arith.addf %9, %11 : vector<8x32xf32>
    %c0_13 = arith.constant 0 : index
    %c0_14 = arith.constant 0 : index
    %c0_15 = arith.constant 0 : index
    %13 = vector.load %arg3[%c0_13, %c0_14, %c0_15] : memref<1x8x32xf32, #tpu.memory_space<vmem>>, vector<1x8x32xf32>
    %14 = vector.shape_cast %13 : vector<1x8x32xf32> to vector<8x32xf32>
    %15 = arith.addf %14, %12 : vector<8x32xf32>
    %cst_16 = arith.constant dense<0.000000e+00> : vector<8xf32>
    %16 = vector.multi_reduction <add>, %15, %cst_16 [1] : vector<8x32xf32> to vector<8xf32>
    %17 = vector.shape_cast %16 : vector<8xf32> to vector<8x1xf32>
    %cst_17 = arith.constant 3.200000e+01 : f32
    %18 = vector.broadcast %cst_17 : f32 to vector<8x1xf32>
    %19 = arith.divf %17, %18 : vector<8x1xf32>
    %20 = vector.broadcast %19 : vector<8x1xf32> to vector<8x32xf32>
    %21 = arith.subf %15, %20 : vector<8x32xf32>
    %22 = arith.mulf %21, %21 : vector<8x32xf32>
    %cst_18 = arith.constant dense<0.000000e+00> : vector<8xf32>
    %23 = vector.multi_reduction <add>, %22, %cst_18 [1] : vector<8x32xf32> to vector<8xf32>
    %24 = vector.shape_cast %23 : vector<8xf32> to vector<8x1xf32>
    %cst_19 = arith.constant 3.200000e+01 : f32
    %25 = vector.broadcast %cst_19 : f32 to vector<8x1xf32>
    %26 = arith.divf %24, %25 : vector<8x1xf32>
    %cst_20 = arith.constant 9.99999996E-13 : f32
    %27 = vector.broadcast %cst_20 : f32 to vector<8x1xf32>
    %28 = arith.addf %26, %27 : vector<8x1xf32>
    %29 = math.rsqrt %28 : vector<8x1xf32>
    %30 = vector.broadcast %29 : vector<8x1xf32> to vector<8x32xf32>
    %31 = arith.mulf %21, %30 : vector<8x32xf32>
    %c0_21 = arith.constant 0 : index
    %c0_22 = arith.constant 0 : index
    %32 = vector.load %arg8[%c0_21, %c0_22] : memref<1x32xf32, #tpu.memory_space<vmem>>, vector<1x32xf32>
    %33 = vector.broadcast %32 : vector<1x32xf32> to vector<8x32xf32>
    %34 = arith.mulf %31, %33 : vector<8x32xf32>
    %c0_23 = arith.constant 0 : index
    %c0_24 = arith.constant 0 : index
    %35 = vector.load %arg9[%c0_23, %c0_24] : memref<1x32xf32, #tpu.memory_space<vmem>>, vector<1x32xf32>
    %36 = vector.broadcast %35 : vector<1x32xf32> to vector<8x32xf32>
    %37 = arith.addf %34, %36 : vector<8x32xf32>
    %c0_25 = arith.constant 0 : index
    %c0_26 = arith.constant 0 : index
    %c0_27 = arith.constant 0 : index
    %38 = vector.load %arg10[%c0_25, %c0_26, %c0_27] : memref<1x8x32xf32, #tpu.memory_space<vmem>>, vector<1x8x32xf32>
    %39 = vector.shape_cast %38 : vector<1x8x32xf32> to vector<8x32xf32>
    %40 = vector.shape_cast %37 : vector<8x32xf32> to vector<1x8x32xf32>
    tpu.vector_store %arg10[%c0_25, %c0_26, %c0_27], %40 {strides = array<i32>} : memref<1x8x32xf32, #tpu.memory_space<vmem>>, vector<1x8x32xf32>,
    return
  }
  func.func @transform_0(%arg0: i32, %arg1: i32) -> (i32, i32, i32) {
    %c0_i32 = arith.constant 0 : i32
    %c0_i32_0 = arith.constant 0 : i32
    %c0_i32_1 = arith.constant 0 : i32
    return %arg0, %c0_i32, %c0_i32_0 : i32, i32, i32
  }
  func.func @transform_1(%arg0: i32, %arg1: i32) -> (i32, i32, i32) {
    %c0_i32 = arith.constant 0 : i32
    %c0_i32_0 = arith.constant 0 : i32
    return %arg0, %arg1, %c0_i32 : i32, i32, i32
  }
  func.func @transform_2(%arg0: i32, %arg1: i32) -> (i32, i32) {
    %c0_i32 = arith.constant 0 : i32
    %c0_i32_0 = arith.constant 0 : i32
    return %arg1, %c0_i32 : i32, i32
  }
  func.func @transform_3(%arg0: i32, %arg1: i32) -> (i32, i32) {
    %c0_i32 = arith.constant 0 : i32
    %c0_i32_0 = arith.constant 0 : i32
    return %arg1, %c0_i32 : i32, i32
  }
  func.func @transform_4(%arg0: i32, %arg1: i32) -> (i32, i32) {
    %c0_i32 = arith.constant 0 : i32
    %c0_i32_0 = arith.constant 0 : i32
    %c0_i32_1 = arith.constant 0 : i32
    return %c0_i32, %c0_i32_0 : i32, i32
  }
  func.func @transform_5(%arg0: i32, %arg1: i32) -> (i32, i32) {
    %c0_i32 = arith.constant 0 : i32
    %c0_i32_0 = arith.constant 0 : i32
    %c0_i32_1 = arith.constant 0 : i32
    return %c0_i32, %c0_i32_0 : i32, i32
  }
  func.func @transform_6(%arg0: i32, %arg1: i32) -> (i32, i32) {
    %c0_i32 = arith.constant 0 : i32
    %c0_i32_0 = arith.constant 0 : i32
    %c0_i32_1 = arith.constant 0 : i32
    return %c0_i32, %c0_i32_0 : i32, i32
  }
  func.func @transform_7(%arg0: i32, %arg1: i32) -> (i32, i32) {
    %c0_i32 = arith.constant 0 : i32
    %c0_i32_0 = arith.constant 0 : i32
    %c0_i32_1 = arith.constant 0 : i32
    return %c0_i32, %c0_i32_0 : i32, i32
  }
  func.func @transform_8(%arg0: i32, %arg1: i32) -> (i32, i32, i32) {
    %c0_i32 = arith.constant 0 : i32
    %c0_i32_0 = arith.constant 0 : i32
    return %arg0, %arg1, %c0_i32 : i32, i32, i32
  }
}

</mosaic_0001>

<bundles_post_ra>
// kernel: tpu_custom_call.1
= control target key start
LH: loop header
LB: loop body
LE: loop exit
PB: predicated region body
PF: predicated region fallthrough
CT: control target
= control target key end

     0   :  { %s1637_s0 = inlined_call_operand.hbm [shape: bf16[2,8,32], index: 0, kind: input, shape index: {}]   ;;  %s1638_s1 = inlined_call_operand.hbm [shape: f32[2,8,32], index: 1, kind: input, shape index: {}]   ;;  %s1639_s2 = inlined_call_operand.hbm [shape: bf16[8,8], index: 2, kind: input, shape index: {}]   ;;  %s1640_s3 = inlined_call_operand.hbm [shape: bf16[8,8], index: 3, kind: input, shape index: {}]   ;;  %s1641_s4 = inlined_call_operand.hbm [shape: bf16[32,32], index: 4, kind: input, shape index: {}]   ;;  %s1642_s5 = inlined_call_operand.vmem [shape: bf16[32,32], index: 5, kind: input, shape index: {}]   ;;  %s1643_s6 = inlined_call_operand.vmem [shape: f32[1,32], index: 6, kind: input, shape index: {}]   ;;  %s1644_s7 = inlined_call_operand.vmem [shape: f32[1,32], index: 7, kind: input, shape index: {}]   ;;  %s1645_s8 = inlined_call_operand.hbm [shape: f32[2,8,32], index: 8, kind: output, shape index: {}]  }
   0x1   :  { %1652 = sst [smem:[#allocation19_spill]] %s1637_s0 }
   0x2   :  { %1653 = sst [smem:[#allocation20_spill]] %s1639_s2 }
   0x3   :  { %1654 = sst [smem:[#allocation21_spill]] %s1640_s3 }
   0x4   :  { %1655 = sst [smem:[#allocation22_spill]] %s1641_s4 }
   0x5   :  { %13 = vsyncpa [#allocation3], 0 }
   0x6   :  { %15 = vsyncpa [#allocation3 + $0x1], 0 }
   0x7   :  { %16 = vsyncpa [#allocation6], 0 }
   0x8   :  { %18 = vsyncpa [#allocation6 + $0x1], 0 }
   0x9   :  { %19 = vsyncpa [#allocation9], 0 }
   0xa   :  { %20 = vsyncpa [#allocation4], 0 }
   0xb   :  { %22 = vsyncpa [#allocation4 + $0x1], 0  ;;  %s1300_s27 = smov 0   ;;  %s1302_s28 = smov 0  }
   0xc   :  { %s1304_s29 = smov 0   ;;  %s1306_s30 = smov 0  }
   0xd   :  { %s1308_s9 = smov 0   ;;  %s1310_s10 = smov 0  }
   0xe LB: > { %1656 = sst [smem:[#allocation17_spill]] %s1223_s27  ;;  %s1331_s11 = sadd.s32 4294967295, %s1243_s10   ;;  %s1243_s10 = sphi %s1310_s10, %s28_s10   ;;  %s1239_s9 = sphi %s1308_s9, %s1686_s9   ;;  %s1235_s30 = sphi %s1306_s30, %s1685_s30   ;;  %s1231_s29 = sphi %s1304_s29, %s1684_s29   ;;  %s1227_s28 = sphi %s1302_s28, %s1683_s28   ;;  %s1223_s27 = sphi %s1300_s27, %s1682_s27  }
   0xf   : > { %s828_s12 = sadd.s32 4294967294, %s1243_s10   ;;  %p60_p0 = scmp.ne.s32.totalorder %s1227_s28, %s1223_s27 }
  0x10   : > { %p1646_p1 = scmp.eq.s32.totalorder %s1331_s11, 0  ;;  %p256_p3 = scmp.eq.s32.totalorder %s828_s12, 1 }
  0x11   : > { %p829_p5 = scmp.ge.s32.totalorder %s1243_s10, 1  ;;  %p263_p7 = scmp.lt.s32.totalorder %s1243_s10, 3 }
  0x12   : > { %p1340_p4 = por %p1646_p1, %p60_p0  ;;  %p1345_p6 = por %p256_p3, %p60_p0 }
  0x13   : > { %p1350_p8 = pnand %p829_p5, %p263_p7  ;;  %s1245_s16 = smov [#allocation7]  }
  0x14   : > { %s1657_s13 = scalar_select %p1340_p4, 1, 0 }
  0x15   : > { %s1658_s14 = scalar_select %p1345_p6, 1, 0 }
  0x16   : > { %s1660_s15 = scalar_select %p1350_p8, 1, 0 }
  0x17   : > { %1659 = sst [smem:[#allocation18_spill]] %s1658_s14  ;;  %s278_s17 = sshll.u32 %s1245_s16, 4  ;;  %s279_s17 = int_to_ptr.vmem [resolvable:$true] %s278_s17 }
  0x18   : > { %p915_p10 = pneg %p1350_p8  ;;  %s1246_s18 = smov [#allocation8]  }
  0x19   : > { %s291_s19 = sshll.u32 %s1246_s18, 4  ;;  %s1247_s21 = smov [#allocation10]   ;;  %s1363_s19 = int_to_ptr.vmem [resolvable:$true] %s291_s19 }
  0x1a   : > { %p1359_p11 = pnand %p915_p10, %p1646_p1  ;;  %s301_s22 = sshll.u32 %s1247_s21, 4  ;;  %s1365_s22 = int_to_ptr.vmem [resolvable:$true] %s301_s22 }
  0x1b   : > { %s1662_s2 = sld [smem:[#allocation20_spill]] }
  0x1c   : > { %p1375_p13 = pneg %p1359_p11 }
  0x21   : > { %s1005_s25 = scalar_lea.hbm %s1662_s2, 64 }
  0x22   : > { %p1006_p12 = scmp.ne.s32.totalorder %s1662_s2, %s1005_s25  ;;  %p1012_p5 = scmp.lt.u32.totalorder %s1005_s25, %s1662_s2 }
  0x24   : > { %p1008_p0 = pnand %p1375_p13, %p1006_p12 }
  0x26   : > { %p1009_p3 = pneg %p1008_p0 }
  0x28   : > { %p1014_p7 = pnand %p1012_p5, %p1009_p3 }
  0x2a   : > { %1017 = shalt.err (!%p1014_p7)
}
  0x2b   : > { %s1018_s23 = scalar_lea.vmem %s279_s17, 64  ;;  %p1026_p2 = scmp.lt.s32.totalorder %s279_s17, %s279_s17 }
  0x2c   : > { %p1019_p10 = scmp.ne.s32.totalorder %s279_s17, %s1018_s23  ;;  %p1027_p6 = scmp.lt.s32.totalorder %s1018_s23, %s1018_s23 }
  0x2e   : > { %p1021_p9 = pnand %p1019_p10, %p1375_p13  ;;  %p1028_p4 = por %p1027_p6, %p1026_p2 }
  0x30   : > { %p1022_p1 = pneg %p1021_p9 }
  0x32   : > { %p1029_p8 = pnand %p1028_p4, %p1022_p1 }
  0x34   : > { %1032 = shalt.err (!%p1029_p8)
}
  0x35   : > { %918 = dma.hbm_to_vmem [thread:$0]  (!%p1359_p11), %s1662_s2, 64, %s279_s17, [#allocation6]  }
  0x36   : > { %s1664_s3 = sld [smem:[#allocation21_spill]] }
  0x3c   : > { %s1033_s18 = scalar_lea.hbm %s1664_s3, 64 }
  0x3d   : > { %p1034_p9 = scmp.ne.s32.totalorder %s1664_s3, %s1033_s18  ;;  %p1040_p1 = scmp.lt.u32.totalorder %s1033_s18, %s1664_s3 }
  0x3f   : > { %p1036_p12 = pnand %p1034_p9, %p1375_p13 }
  0x41   : > { %p1037_p2 = pneg %p1036_p12 }
  0x43   : > { %p1042_p4 = pnand %p1040_p1, %p1037_p2 }
  0x45   : > { %1045 = shalt.err (!%p1042_p4)
}
  0x46   : > { %s1046_s17 = scalar_lea.vmem %s1363_s19, 64  ;;  %p1054_p3 = scmp.lt.s32.totalorder %s1363_s19, %s1363_s19 }
  0x47   : > { %p1047_p6 = scmp.ne.s32.totalorder %s1363_s19, %s1046_s17  ;;  %p1055_p5 = scmp.lt.s32.totalorder %s1046_s17, %s1046_s17 }
  0x49   : > { %p1049_p8 = pnand %p1047_p6, %p1375_p13  ;;  %p1056_p7 = por %p1055_p5, %p1054_p3 }
  0x4b   : > { %p1050_p0 = pneg %p1049_p8 }
  0x4d   : > { %p1057_p10 = pnand %p1056_p7, %p1050_p0 }
  0x4f   : > { %1060 = shalt.err (!%p1057_p10)
}
  0x50   : > { %921 = dma.hbm_to_vmem [thread:$0]  (!%p1359_p11), %s1664_s3, 64, %s1363_s19, [#allocation9]  }
  0x51   : > { %s1665_s4 = sld [smem:[#allocation22_spill]] }
  0x57   : > { %s1061_s25 = scalar_lea.hbm %s1665_s4, 256 }
  0x58   : > { %p1062_p9 = scmp.ne.s32.totalorder %s1665_s4, %s1061_s25  ;;  %p1068_p1 = scmp.lt.u32.totalorder %s1061_s25, %s1665_s4 }
  0x5a   : > { %p1064_p12 = pnand %p1062_p9, %p1375_p13 }
  0x5c   : > { %p1065_p2 = pneg %p1064_p12 }
  0x5e   : > { %p1070_p4 = pnand %p1068_p1, %p1065_p2 }
  0x60   : > { %1073 = shalt.err (!%p1070_p4)
}
  0x61   : > { %s1074_s19 = scalar_lea.vmem %s1365_s22, 256  ;;  %p1082_p3 = scmp.lt.s32.totalorder %s1365_s22, %s1365_s22 }
  0x62   : > { %p1075_p6 = scmp.ne.s32.totalorder %s1365_s22, %s1074_s19  ;;  %p1083_p5 = scmp.lt.s32.totalorder %s1074_s19, %s1074_s19 }
  0x64   : > { %p1077_p8 = pnand %p1075_p6, %p1375_p13  ;;  %p1084_p7 = por %p1083_p5, %p1082_p3 }
  0x66   : > { %p1078_p0 = pneg %p1077_p8 }
  0x68   : > { %p1085_p10 = pnand %p1084_p7, %p1078_p0 }
  0x6a   : > { %1088 = shalt.err (!%p1085_p10)
}
  0x6b   : > { %s1248_s17 = smov 64   ;;  %s1249_s16 = smov 4  }
  0x6c   : > { %924 = dma.hbm_to_vmem [thread:$0]  (!%p1359_p11), %s1665_s4, 256, %s1365_s22, [#allocation9], %s1248_s17, %s1248_s17, %s1249_s16  }
  0x6d   : > { %s47_s24 = sadd.s32 1, %s1231_s29  ;;  %s40_s26 = sadd.s32 1, %s1239_s9 }
  0x6e   : > { %p54_p13 = scmp.ne.s32.totalorder %s1231_s29, %s1227_s28  ;;  %p42_p9 = scmp.ge.s32.totalorder %s40_s26, 2 }
  0x6f   : > { %p55_p12 = scmp.eq.s32.totalorder %s1243_s10, 0  ;;  %p1666_p2 = scmp.eq.s32.totalorder %s1331_s11, 1 }
  0x70   : > { %p939_p4 = scmp.lt.s32.totalorder %s1243_s10, 2  ;;  %s1688_s26 = smov (%p42_p9, %s40_s26), 0 }
  0x71   : > { %p1444_p1 = por %p1666_p2, %p54_p13  ;;  %p56_p6 = por %p55_p12, %p54_p13 }
  0x72   : > { %s1452_s20 = sand.u32 1, %s1231_s29   ;;  %s44_s22 = ssub.s32 %s1239_s9, %s1688_s26 }
  0x73   : > { %s1667_s25 = scalar_select %p1444_p1, 1, 0 }
  0x74   : > { %p45_p11 = scmp.eq.s32.totalorder %s44_s22, 0  ;;  %s834_s12 = sshll.u32 %s1452_s20, 2 }
  0x75   : > { %s835_s18 = sshll.u32 %s1239_s9, 6  ;;  %s1668_s0 = sld [smem:[#allocation19_spill]] }
  0x76   : > { %s1459_s21 = scalar_select %p45_p11, %s1231_s29, %s47_s24  }
  0x77   : > { %s328_s16 = scalar_lea.vmem [#allocation2], %s834_s12  ;;  %p1470_p8 = pnand %p939_p4, %p56_p6 }
  0x78   : > { %s335_s27 = sshll.u32 %s328_s16, 4  ;;  %s836_s22 = sshll.u32 %s1452_s20, 3  ;;  %s1466_s27 = int_to_ptr.vmem [resolvable:$true] %s335_s27 }
  0x79   : > { %s325_s23 = scalar_lea.sflag [#allocation3], %s1452_s20  ;;  %p1091_p3 = pneg %p1470_p8 }
  0x7b   : > { %s1464_s17 = scalar_lea.hbm %s1668_s0, %s835_s18  ;;  %s1094_s16 = scalar_lea.hbm %s1668_s0, 128 }
  0x7c   : > { %s1089_s18 = scalar_lea.hbm %s1464_s17, 64  ;;  %p1095_p10 = scmp.lt.u32.totalorder %s1464_s17, %s1668_s0 }
  0x7d   : > { %p1090_p0 = scmp.ne.s32.totalorder %s1464_s17, %s1089_s18  ;;  %p1096_p13 = scmp.lt.u32.totalorder %s1094_s16, %s1089_s18 }
  0x7e   : > { %p1098_p12 = scmp.lt.u32.totalorder %s1089_s18, %s1464_s17 }
  0x7f   : > { %p1092_p5 = pnand %p1091_p3, %p1090_p0  ;;  %p1097_p9 = por %p1096_p13, %p1095_p10 }
  0x81   : > { %p1093_p7 = pneg %p1092_p5  ;;  %p1099_p2 = por %p1098_p12, %p1097_p9 }
  0x83   : > { %p1100_p4 = pnand %p1099_p2, %p1093_p7 }
  0x85   : > { %1103 = shalt.err (!%p1100_p4)
}
  0x86   : > { %s1104_s24 = scalar_lea.vmem %s1466_s27, 64  ;;  %s1250_s12 = smov [#allocation2]  }
  0x87   : > { %p1105_p6 = scmp.ne.s32.totalorder %s1466_s27, %s1104_s24  ;;  %s1109_s19 = sshll.u32 %s1250_s12, 4  ;;  %s1110_s19 = int_to_ptr.vmem [resolvable:$false] %s1109_s19 }
  0x88   : > { %s1111_s2 = scalar_lea.vmem %s1110_s19, 128  ;;  %p1112_p5 = scmp.lt.s32.totalorder %s1466_s27, %s1110_s19 }
  0x89   : > { %p1107_p11 = pnand %p1105_p6, %p1091_p3  ;;  %p1113_p10 = scmp.lt.s32.totalorder %s1111_s2, %s1104_s24 }
  0x8b   : > { %p1108_p0 = pneg %p1107_p11  ;;  %p1114_p13 = por %p1113_p10, %p1112_p5 }
  0x8d   : > { %p1115_p9 = pnand %p1114_p13, %p1108_p0 }
  0x8f   : > { %1118 = shalt.err (!%p1115_p9)
}
  0x90   : > { %928 = dma.hbm_to_vmem [thread:$0]  (!%p1470_p8), %s1464_s17, 64, %s1466_s27, %s325_s23  }
  0x91   : > { %s837_s3 = sshll.u32 %s1239_s9, 7  ;;  %s346_s24 = scalar_lea.vmem [#allocation5], %s836_s22 }
  0x92   : > { %s1506_s12 = scalar_lea.hbm %s1638_s1, %s837_s3  ;;  %s354_s19 = sshll.u32 %s346_s24, 4  ;;  %s355_s19 = int_to_ptr.vmem [resolvable:$true] %s354_s19 }
  0x93   : > { %s1670_s2 = sand.u32 1, %s1243_s10   ;;  %s1119_s4 = scalar_lea.hbm %s1506_s12, 128 }
  0x94   : > { %s343_s0 = scalar_lea.sflag [#allocation6], %s1670_s2  ;;  %p1120_p7 = scmp.ne.s32.totalorder %s1506_s12, %s1119_s4 }
  0x95   : > { %s1124_s23 = scalar_lea.hbm %s1638_s1, 256  ;;  %p1125_p4 = scmp.lt.u32.totalorder %s1506_s12, %s1638_s1 }
  0x96   : > { %p1122_p12 = pnand %p1120_p7, %p1091_p3  ;;  %p1126_p6 = scmp.lt.u32.totalorder %s1124_s23, %s1119_s4 }
  0x97   : > { %p1128_p0 = scmp.lt.u32.totalorder %s1119_s4, %s1506_s12 }
  0x98   : > { %p1123_p2 = pneg %p1122_p12  ;;  %p1127_p11 = por %p1126_p6, %p1125_p4 }
  0x9a   : > { %p1129_p5 = por %p1128_p0, %p1127_p11 }
  0x9c   : > { %p1130_p10 = pnand %p1129_p5, %p1123_p2 }
  0x9e   : > { %1133 = shalt.err (!%p1130_p10)
}
  0x9f   : > { %s1134_s22 = scalar_lea.vmem %s355_s19, 128  ;;  %s1251_s18 = smov [#allocation5]  }
  0xa0   : > { %p1135_p13 = scmp.ne.s32.totalorder %s355_s19, %s1134_s22  ;;  %s1139_s16 = sshll.u32 %s1251_s18, 4  ;;  %s1140_s16 = int_to_ptr.vmem [resolvable:$false] %s1139_s16 }
  0xa1   : > { %s1141_s24 = scalar_lea.vmem %s1140_s16, 256  ;;  %p1142_p12 = scmp.lt.s32.totalorder %s355_s19, %s1140_s16 }
  0xa2   : > { %p1137_p9 = pnand %p1135_p13, %p1091_p3  ;;  %p1143_p1 = scmp.lt.s32.totalorder %s1141_s24, %s1134_s22 }
  0xa4   : > { %p1138_p7 = pneg %p1137_p9  ;;  %p1144_p4 = por %p1143_p1, %p1142_p12 }
  0xa6   : > { %p1145_p6 = pnand %p1144_p4, %p1138_p7 }
  0xa8   : > { %1148 = shalt.err (!%p1145_p6)
}
  0xa9   : > { %931 = dma.hbm_to_vmem [thread:$0]  (!%p1470_p8), %s1506_s12, 128, %s355_s19, %s343_s0  }
  0xaa   : > { %p1671_p2 = scmp.ne.s32.totalorder %s1660_s15, 0 }
  0xab   : > { %s1534_s4 = sand.u32 (!%p1671_p2), 1, %s1227_s28   ;;  %p1672_p3 = scmp.ne.s32.totalorder (!%p1671_p2), %s1657_s13, 0 }
  0xac   : > { %363 = sbr.rel (%p1671_p2) target bundleno = 952 (0x3b8), region = 52  ;;  %s839_s2 = sshll.u32 (!%p1671_p2), %s1534_s4, 2 }
  0xad   : > { %s366_s17 = scalar_lea.sflag (!%p1671_p2), [#allocation3], %s1534_s4  ;;  %s369_s27 = scalar_lea.vmem (!%p1671_p2), [#allocation2], %s839_s2 }
  0xb3   : > { %1202 = dma.done.wait (%p1672_p3), %s366_s17, 64  }
  0xb4   : > { %1204 = vsyncadd (%p1672_p3), %s366_s17, 4294967232  ;;  %s374_s0 = sand.u32 1, %s1331_s11   ;;  %s840_s15 = sshll.u32 %s1534_s4, 3 }
  0xb5   : > { %s375_s14 = scalar_lea.sflag [#allocation6], %s374_s0  ;;  %s1546_s12 = scalar_lea.vmem [#allocation5], %s840_s15 }
  0xb6   : > { %1206 = dma.done.wait (%p1672_p3), %s375_s14, 128  }
  0xb7   : > { %1208 = vsyncadd (%p1672_p3), %s375_s14, 4294967168  ;;  %p1673_p1 = scmp.eq.s32.totalorder %s1331_s11, 0 }
  0xb9   : > { %1210 = dma.done.wait (%p1673_p1), [#allocation6], 64   ;;  %p1674_p8 = pmov %p1673_p1 }
  0xba   : > { %p1675_p11 = pmov %p1673_p1 }
  0xbb   : > { %1212 = vsyncadd (%p1674_p8), [#allocation6], 4294967232 }
  0xbc   : > { %1214 = dma.done.wait (%p1675_p11), [#allocation9], 320   ;;  %p1676_p0 = pmov %p1673_p1 }
  0xbd   : > { %v1252_v0 = vmov 0.0   ;;  %vm1253_vm0 = vmmov 0   ;;  %vm435_vm1 = vcmask 1043456   ;;  %v429_v1 = vld [vmem:[%s369_s27] sm:$0xf]  ;;  %v999_v5 = vld [vmem:[%s1642_s5] sm:$0xff]  }
  0xbe   : > { %1216 = vsyncadd (%p1676_p0), [#allocation9], 4294966976  ;;  %869 = vmatprep.subr.bf16.mxu0 %v1252_v0  ;;  %875 = vmatprep.subr.bf16.mxu1 %v1252_v0  ;;  %v430_v2 = vld [vmem:[#allocation7] sm:$0xf]  ;;  %v480_v3 = vld [vmem:[#allocation8] sm:$0xf] }
  0xbf   : > { %871 = vmatprep.mubr.msk.bf16.mxu0 %vm1253_vm0, %v1252_v0  ;;  %877 = vmatprep.mubr.msk.bf16.mxu1 %vm1253_vm0, %v1252_v0  ;;  %v437_v4 = vsel %vm435_vm1, %v429_v1, 0  ;;  %vm431_vm2 = vcmask 64512   ;;  %v1000_v6 = vld [vmem:[#allocation10] sm:$0xff]   ;;  %v1001_v7 = vld [vmem:[%s1642_s5 + $0x8] sm:$0xff]   ;;  %v1002_v8 = vld [vmem:[#allocation10 + $0x8] sm:$0xff]   ;;  %vm545_vm3 = vcmask 261120  }
  0xc0   : > { %870 = vmatpush3.bf16.msra.mxu0 %v437_v4  ;;  %876 = vmatpush3.bf16.msra.mxu1 %v437_v4  ;;  %v644_v21 = vld [vmem:[%s1546_s12] sm:$0xff]  ;;  %s856_s16 = sshll.u32 %s1235_s30, 7  ;;  %s427_s24 = scalar_lea.vmem [#allocation11], %s840_s15 }
  0xc1   : > { %881 = vmatprep.subr.bf16.mxu0 %v1252_v0  ;;  %889 = vmatprep.subr.bf16.mxu1 %v1252_v0  ;;  %v853_v40 = vld [vmem:[%s1643_s6] ss:$0 sm:$0xff]  ;;  %s692_s2 = sshll.u32 %s427_s24, 4  ;;  %s1587_s0 = scalar_lea.hbm %s1645_s8, %s856_s16  ;;  %s1589_s2 = int_to_ptr.vmem [resolvable:$true] %s692_s2 }
  0xc2   : > { %v854_v42 = vld [vmem:[%s1644_s7] ss:$0 sm:$0xff]  ;;  %s678_s14 = scalar_lea.sflag [#allocation4], %s1534_s4  ;;  %s1149_s12 = scalar_lea.vmem %s1589_s2, 128 }
  0xc3   : > { %872 = vmatmul.mubr.msk.bf16.vlgmr.msra.gmra.mrb[0].mxu0 %vm431_vm2, %v430_v2  ;;  %878 = vmatmul.mubr.msk.bf16.vlgmr.msra.gmra.mrb[0].mxu1 %vm431_vm2, %v480_v3  ;;  %p1150_p5 = scmp.ne.s32.totalorder %s1589_s2, %s1149_s12  ;;  %p1677_p10 = scmp.ne.s32.totalorder %s1667_s25, 0 }
  0xc4   : > { %882 = vmatpush3.bf16.msra.mxu0 %v999_v5  ;;  %890 = vmatpush3.bf16.msra.mxu1 %v1000_v6  ;;  %s1254_s30 = smov [#allocation11]  }
  0xc5   : > { %883 = vmatprep.subr.bf16.mxu0 %v1252_v0  ;;  %891 = vmatprep.subr.bf16.mxu1 %v1252_v0  ;;  %p1151_p13 = pnand %p1150_p5, %p1677_p10  ;;  %s1153_s15 = sshll.u32 %s1254_s30, 4  ;;  %s1154_s15 = int_to_ptr.vmem [resolvable:$false] %s1153_s15 }
  0xc6   : > { %885 = vmatprep.mubr.msk.bf16.mxu0 %vm1253_vm0, %v1252_v0  ;;  %893 = vmatprep.mubr.msk.bf16.mxu1 %vm1253_vm0, %v1252_v0  ;;  %s1155_s13 = scalar_lea.vmem %s1154_s15, 256  ;;  %p1156_p7 = scmp.lt.s32.totalorder %s1589_s2, %s1154_s15 }
  0xc7   : > { %p1152_p9 = pneg %p1151_p13  ;;  %p1157_p12 = scmp.lt.s32.totalorder %s1155_s13, %s1149_s12 }
  0xc8   : > { %884 = vmatpush3.bf16.msra.mxu0 %v1001_v7  ;;  %892 = vmatpush3.bf16.msra.mxu1 %v1002_v8 }
  0xc9   : > { %p1158_p4 = por %p1157_p12, %p1156_p7 }
  0xcb   : > { %p1159_p6 = pnand %p1158_p4, %p1152_p9 }
 0x196   : > { %v473_v9 = vpop.f32.mrb[0].mxu0  ;;  %v518_v10 = vpop.f32.mrb[0].mxu1 }
 0x197   : > { %v479_v11 = vpack.c.bf16 %v473_v9, %v473_v9  ;;  %v524_v12 = vpack.c.bf16 %v518_v10, %v518_v10  ;;  %v873_v13 = vpop.f32.mrb[1].mxu0  ;;  %v879_v14 = vpop.f32.mrb[1].mxu1 }
 0x198   : > { %v476_v15 = vpop.f32.mrb[2].mxu0  ;;  %v521_v16 = vpop.f32.mrb[2].mxu1 }
 0x199   : > { %v874_v17 = vpop.f32.mrb[3].mxu0  ;;  %v880_v18 = vpop.f32.mrb[3].mxu1  ;;  %886 = vmatmul.mubr.msk.bf16.vlgmr.msra.gmra.mrb[4].mxu0 %vm545_vm3, %v524_v12  ;;  %894 = vmatmul.mubr.msk.bf16.vlgmr.msra.gmra.mrb[4].mxu1 %vm545_vm3, %v479_v11 }
 0x26c   : > { %v583_v19 = vpop.f32.mrb[4].mxu0  ;;  %v638_v20 = vpop.f32.mrb[4].mxu1 }
 0x26d   : > { %v639_v22 = vadd.f32 %v638_v20, %v583_v19  ;;  %v887_v23 = vpop.f32.mrb[5].mxu0  ;;  %v895_v24 = vpop.f32.mrb[5].mxu1 }
 0x26e   : > { %v586_v25 = vpop.f32.mrb[6].mxu0  ;;  %v641_v26 = vpop.f32.mrb[6].mxu1 }
 0x26f   : > { %v888_v27 = vpop.f32.mrb[7].mxu0  ;;  %v896_v28 = vpop.f32.mrb[7].mxu1  ;;  %v645_v29 = vadd.f32 %v644_v21, %v639_v22 }
 0x271   : > { %v646_v30 = vsel %vm545_vm3, %v645_v29, 0.0 }
 0x272   : > { %647 = vadd.xlane.f32.xlu0 %v646_v30 }
 0x2ff   : > { %v648_v31 = vpop.xlane.xlu0 %647 }
 0x300   : > { %v650_v32 = vmul.f32 0.03125, %v648_v31 }
 0x302   : > { %v651_v33 = vsub.f32 %v645_v29, %v650_v32 }
 0x304   : > { %v652_v34 = vmul.f32 %v651_v33, %v651_v33 }
 0x306   : > { %v653_v35 = vsel %vm545_vm3, %v652_v34, 0.0 }
 0x307   : > { %654 = vadd.xlane.f32.xlu0 %v653_v35 }
 0x394   : > { %v655_v36 = vpop.xlane.xlu0 %654 }
 0x395   : > { %v656_v37 = vmul.f32 0.03125, %v655_v36 }
 0x397   : > { %v657_v38 = vadd.f32 1e-12, %v656_v37 }
 0x399   : > { %1003 = vrsqrt.f32 %v657_v38 }
 0x3a3   : > { %v1004_v39 = vpop.eup %1003 }
 0x3a4   : > { %v659_v41 = vmul.f32 %v1004_v39, %v651_v33 }
 0x3a6   : > { %v667_v43 = vmul.f32 %v853_v40, %v659_v41 }
 0x3a8   : > { %v675_v44 = vadd.f32 %v854_v42, %v667_v43 }
 0x3aa   : > { %676 = vst.msk [vmem:[%s427_s24] sm:$0xff] %vm545_vm3, %v675_v44 }
 0x3ab   : > { %1162 = shalt.err (!%p1159_p6)
}
 0x3ac   : > { %s1163_s4 = scalar_lea.hbm %s1587_s0, 128  ;;  %s1167_s23 = scalar_lea.hbm %s1645_s8, 256 }
 0x3ad   : > { %p1164_p2 = scmp.ne.s32.totalorder %s1587_s0, %s1163_s4  ;;  %p1168_p8 = scmp.lt.u32.totalorder %s1587_s0, %s1645_s8 }
 0x3ae   : > { %p1169_p11 = scmp.lt.u32.totalorder %s1167_s23, %s1163_s4  ;;  %p1171_p5 = scmp.lt.u32.totalorder %s1163_s4, %s1587_s0 }
 0x3af   : > { %p1165_p3 = pnand %p1164_p2, %p1677_p10 }
 0x3b0   : > { %p1170_p0 = por %p1169_p11, %p1168_p8 }
 0x3b1   : > { %p1166_p1 = pneg %p1165_p3 }
 0x3b2   : > { %p1172_p13 = por %p1171_p5, %p1170_p0 }
 0x3b4   : > { %p1173_p9 = pnand %p1172_p13, %p1166_p1 }
 0x3b6   : > { %1176 = shalt.err (!%p1173_p9)
}
 0x3b7   : > { %913 = dma.vmem_to_hbm [thread:$0]  (%p1677_p10), %s1589_s2, 128, %s1587_s0, %s678_s14  }
 0x3b8 PF: > { %s1678_s22 = sld [smem:[#allocation17_spill]]  ;;  %s1679_s18 = sld [smem:[#allocation18_spill]] }
 0x3b9   : > { %p1681_p12 = scmp.ge.s32.totalorder %s1243_s10, 2 }
 0x3be   : > { %s704_s16 = sand.u32 1, %s1678_s22   ;;  %p1680_p7 = scmp.ne.s32.totalorder %s1679_s18, 0 }
 0x3bf   : > { %s705_s24 = scalar_lea.sflag [#allocation4], %s704_s16 }
 0x3c0   : > { %p933_p4 = pnand %p1681_p12, %p1680_p7 }
 0x3c2   : > { %1218 = dma.done.wait (!%p933_p4), %s705_s24, 128  }
 0x3c3   : > { %1220 = vsyncadd (!%p933_p4), %s705_s24, 4294967168  ;;  %s28_s10 = sadd.s32 1, %s1243_s10   ;;  %s1682_s27 = smov %s1227_s28 }
 0x3c4   : > { %p25_p6 = scmp.ge.s32.totalorder %s28_s10, 4   ;;  %s1683_s28 = smov %s1231_s29 }
 0x3c5   : > { %s1684_s29 = smov %s1459_s21  ;;  %s1685_s30 = smov %s1239_s9 }
 0x3c6   : > { %s1686_s9 = smov %s1688_s26  ;;  %27 = sbr.rel (!%p25_p6) target bundleno = 14 (0xe), region = 124 }
 0x3cd   :  { %710 = vsyncpa [#allocation3], 1 }
 0x3ce   :  { %712 = vsyncpa [#allocation3 + $0x1], 1 }
 0x3cf   :  { %713 = vsyncpa [#allocation6], 1 }
 0x3d0   :  { %715 = vsyncpa [#allocation6 + $0x1], 1 }
 0x3d1   :  { %716 = vsyncpa [#allocation9], 1 }
 0x3d2   :  { %717 = vsyncpa [#allocation4], 1 }
 0x3d3   :  { %719 = vsyncpa [#allocation4 + $0x1], 1 }

</bundles_post_ra>
